<compile_context>
chip_gen: v6e
topology: v6e:2x2x1
jax: 0.10.0
libtpu: 0.0.40
codegen_flags: <defaults>
</compile_context>

<pallas_src>
import jax
import jax.numpy as jnp
from jax.experimental import pallas as pl
from jax.experimental.pallas import tpu as pltpu


def _edit_encoder_kernel(ins_ref, insx_ref, dele_ref, delx_ref,
                         m_ins_ref, m_insx_ref, m_del_ref, m_delx_ref,
                         wt_ref, out_ref):
    """One batch-block of the fused masked-sum + prenoise projection.

    ins/insx/dele/delx : (bb, E, D) f32 embedding blocks
    m_*                : (bb, E, 1) f32 masks (trailing singleton -> lane replicate)
    wt_ref             : (D, H)     f32 pre-transposed prenoise weight (resident)
    out_ref            : (2, bb, H) f32 — out_ref[0]=insert_set, out_ref[1]=delete_set
    """
    # Masked values; mask broadcast over the lane (D) axis is a pure VPU replicate.
    ins_masked = ins_ref[...] * m_ins_ref[...] + insx_ref[...] * m_insx_ref[...]
    del_masked = dele_ref[...] * m_del_ref[...] + delx_ref[...] * m_delx_ref[...]

    # Reduce over the edits axis.
    insert_embed = jnp.sum(ins_masked, axis=1)     # (bb, D)
    delete_embed = jnp.sum(del_masked, axis=1)     # (bb, D)

    wt = wt_ref[...]                               # (D, H)

    # Two small MXU calls; full-width, lane-dense stores (no lane-offset slices).
    out_ref[0] = jnp.dot(insert_embed, wt, preferred_element_type=jnp.float32)
    out_ref[1] = jnp.dot(delete_embed, wt, preferred_element_type=jnp.float32)


def _round_up(x, m):
    return -(-x // m) * m


def _pick_batch_block(batch, max_edits, word_dim, half_dim,
                      vmem_budget_bytes=24 << 20, cap=256):
    """Largest batch block whose double-buffered VMEM working set fits the budget.

    Accounts for TPU tile padding: the last dim of each block pads to 128 lanes
    (so the (bb, E, 1) mask blocks each cost a full 128-lane tile) and the
    second-to-last pads to 8 sublanes.  cap=256 keeps blocks small enough for
    v7x's 64 MiB VMEM and leaves room for >=2 grid blocks (megacore) on large
    batches.
    """
    d_pad = _round_up(word_dim, 128)
    e_pad = _round_up(max_edits, 8)
    h_pad = _round_up(half_dim, 128)

    def working_set(bb):
        emb = 4 * bb * e_pad * d_pad * 4            # four (bb, E, D) embed blocks
        msk = 4 * bb * e_pad * 128 * 4              # four (bb, E, 1) masks, lane-padded
        out = 2 * _round_up(bb, 8) * h_pad * 4      # one (2, bb, H) output block
        wgt = d_pad * h_pad * 4                     # resident weight
        return 2 * (emb + msk + out) + 2 * wgt      # double-buffered pipeline

    bb = min(batch, cap)
    if batch > 8:
        bb -= bb % 8
        if batch >= 16:
            # prefer at least 2 grid blocks so megacore can shard the batch axis
            bb = min(bb, _round_up(-(-batch // 2), 8))
        bb = max(bb, 8)
        while bb > 8 and working_set(bb) > vmem_budget_bytes:
            bb -= 8
    return max(bb, 1)


def edit_encoder_forward(insert_embeds, insert_mask,
                         insert_embeds_exact, insert_mask_exact,
                         delete_embeds, delete_mask,
                         delete_embeds_exact, delete_mask_exact,
                         w_prenoise):
    B, E, D = insert_embeds.shape
    H = w_prenoise.shape[0]          # edit_dim // 2
    dtype = insert_embeds.dtype

    # Tiny one-time wrapper work only: transpose the (H, D) torch-layout weight to
    # (D, H) and add a trailing singleton dim to the (B, E) masks.  The big embed
    # tensors are passed through untouched (no concat / no re-materialization).
    w_t = jnp.transpose(w_prenoise)                                   # (D, H)
    m_ins = insert_mask.astype(dtype)[..., None]                      # (B, E, 1)
    m_insx = insert_mask_exact.astype(dtype)[..., None]
    m_del = delete_mask.astype(dtype)[..., None]
    m_delx = delete_mask_exact.astype(dtype)[..., None]

    bb = _pick_batch_block(B, E, D, H)
    grid = (pl.cdiv(B, bb),)

    emb_spec = pl.BlockSpec((bb, E, D), lambda b: (b, 0, 0))
    msk_spec = pl.BlockSpec((bb, E, 1), lambda b: (b, 0, 0))
    w_spec = pl.BlockSpec((D, H), lambda b: (0, 0))   # constant index -> stays resident

    out2 = pl.pallas_call(
        _edit_encoder_kernel,
        out_shape=jax.ShapeDtypeStruct((2, B, H), jnp.float32),
        grid=grid,
        in_specs=[emb_spec, emb_spec, emb_spec, emb_spec,
                  msk_spec, msk_spec, msk_spec, msk_spec,
                  w_spec],
        out_specs=pl.BlockSpec((2, bb, H), lambda b: (0, b, 0)),
        compiler_params=pltpu.CompilerParams(
            dimension_semantics=("parallel",),
            vmem_limit_bytes=48 * 1024 * 1024,
        ),
    )(insert_embeds, insert_embeds_exact, delete_embeds, delete_embeds_exact,
      m_ins, m_insx, m_del, m_delx, w_t)

    # torch.cat([insert_set, delete_set], dim=1) on the tiny (B, H) halves.
    return jnp.concatenate([out2[0], out2[1]], axis=1)                # (B, 2H)


def _reference(insert_embeds, insert_mask,
               insert_embeds_exact, insert_mask_exact,
               delete_embeds, delete_mask,
               delete_embeds_exact, delete_mask_exact,
               w_prenoise):
    ins = (insert_embeds * insert_mask[..., None]).sum(1) + \
          (insert_embeds_exact * insert_mask_exact[..., None]).sum(1)
    dele = (delete_embeds * delete_mask[..., None]).sum(1) + \
           (delete_embeds_exact * delete_mask_exact[..., None]).sum(1)
    return jnp.concatenate([ins @ w_prenoise.T, dele @ w_prenoise.T], axis=1)


if __name__ == "__main__":
    # Small shapes consistent with the module's forward signature.
    batch = 4
    max_edits = 8
    word_dim = 32
    edit_dim = 16            # Linear(word_dim, edit_dim // 2, bias=False)
    edit_half = edit_dim // 2

    key = jax.random.PRNGKey(0)
    keys = jax.random.split(key, 9)

    insert_embeds = jax.random.normal(keys[0], (batch, max_edits, word_dim), jnp.float32)
    insert_embeds_exact = jax.random.normal(keys[1], (batch, max_edits, word_dim), jnp.float32)
    delete_embeds = jax.random.normal(keys[2], (batch, max_edits, word_dim), jnp.float32)
    delete_embeds_exact = jax.random.normal(keys[3], (batch, max_edits, word_dim), jnp.float32)

    insert_mask = (jax.random.uniform(keys[4], (batch, max_edits)) > 0.3).astype(jnp.float32)
    insert_mask_exact = (jax.random.uniform(keys[5], (batch, max_edits)) > 0.3).astype(jnp.float32)
    delete_mask = (jax.random.uniform(keys[6], (batch, max_edits)) > 0.3).astype(jnp.float32)
    delete_mask_exact = (jax.random.uniform(keys[7], (batch, max_edits)) > 0.3).astype(jnp.float32)

    # Deterministic parameter init (torch Linear weight layout: (out_features, in_features)).
    w_prenoise = jax.random.normal(keys[8], (edit_half, word_dim), jnp.float32) * 0.1
    # NOTE: self.linear (Linear(edit_dim, edit_dim)) is unused in forward, so it is not materialized.

    out = edit_encoder_forward(insert_embeds, insert_mask,
                               insert_embeds_exact, insert_mask_exact,
                               delete_embeds, delete_mask,
                               delete_embeds_exact, delete_mask_exact,
                               w_prenoise)
    out = jax.block_until_ready(out)

    ref = _reference(insert_embeds, insert_mask,
                     insert_embeds_exact, insert_mask_exact,
                     delete_embeds, delete_mask,
                     delete_embeds_exact, delete_mask_exact,
                     w_prenoise)

    assert out.shape == (batch, edit_dim), out.shape
    assert jnp.allclose(out, ref, atol=1e-5, rtol=1e-5), "mismatch vs reference"
    print("KERNEL_OK")
</pallas_src>

<mosaic_0001>
module attributes {stable_mosaic.version = 11 : i64} {
  func.func @_edit_encoder_kernel(%arg0: i32, %arg1: memref<4x8x32xf32, #tpu.memory_space<vmem>>, %arg2: memref<4x8x32xf32, #tpu.memory_space<vmem>>, %arg3: memref<4x8x32xf32, #tpu.memory_space<vmem>>, %arg4: memref<4x8x32xf32, #tpu.memory_space<vmem>>, %arg5: memref<4x8x1xf32, #tpu.memory_space<vmem>>, %arg6: memref<4x8x1xf32, #tpu.memory_space<vmem>>, %arg7: memref<4x8x1xf32, #tpu.memory_space<vmem>>, %arg8: memref<4x8x1xf32, #tpu.memory_space<vmem>>, %arg9: memref<32x8xf32, #tpu.memory_space<vmem>>, %arg10: memref<2x4x8xf32, #tpu.memory_space<vmem>>) attributes {dimension_semantics = [#tpu.dimension_semantics<parallel>], iteration_bounds = array<i64: 1>, scalar_prefetch = 0 : i64, scratch_operands = 0 : i64, tpu.core_type = #tpu.core_type<tc>, window_params = [{transform_indices = @transform_0, window_bounds = array<i64: 4, 8, 32>}, {transform_indices = @transform_1, window_bounds = array<i64: 4, 8, 32>}, {transform_indices = @transform_2, window_bounds = array<i64: 4, 8, 32>}, {transform_indices = @transform_3, window_bounds = array<i64: 4, 8, 32>}, {transform_indices = @transform_4, window_bounds = array<i64: 4, 8, 1>}, {transform_indices = @transform_5, window_bounds = array<i64: 4, 8, 1>}, {transform_indices = @transform_6, window_bounds = array<i64: 4, 8, 1>}, {transform_indices = @transform_7, window_bounds = array<i64: 4, 8, 1>}, {pipeline_mode = #tpu.pipeline_mode<synchronous>, transform_indices = @transform_8, window_bounds = array<i64: 32, 8>}, {transform_indices = @transform_9, window_bounds = array<i64: 2, 4, 8>}]} {
    %c0 = arith.constant 0 : index
    %c0_0 = arith.constant 0 : index
    %c0_1 = arith.constant 0 : index
    %0 = vector.load %arg1[%c0, %c0_0, %c0_1] : memref<4x8x32xf32, #tpu.memory_space<vmem>>, vector<4x8x32xf32>
    %c0_2 = arith.constant 0 : index
    %c0_3 = arith.constant 0 : index
    %c0_4 = arith.constant 0 : index
    %1 = vector.load %arg5[%c0_2, %c0_3, %c0_4] : memref<4x8x1xf32, #tpu.memory_space<vmem>>, vector<4x8x1xf32>
    %2 = vector.broadcast %1 : vector<4x8x1xf32> to vector<4x8x32xf32>
    %3 = arith.mulf %0, %2 : vector<4x8x32xf32>
    %c0_5 = arith.constant 0 : index
    %c0_6 = arith.constant 0 : index
    %c0_7 = arith.constant 0 : index
    %4 = vector.load %arg2[%c0_5, %c0_6, %c0_7] : memref<4x8x32xf32, #tpu.memory_space<vmem>>, vector<4x8x32xf32>
    %c0_8 = arith.constant 0 : index
    %c0_9 = arith.constant 0 : index
    %c0_10 = arith.constant 0 : index
    %5 = vector.load %arg6[%c0_8, %c0_9, %c0_10] : memref<4x8x1xf32, #tpu.memory_space<vmem>>, vector<4x8x1xf32>
    %6 = vector.broadcast %5 : vector<4x8x1xf32> to vector<4x8x32xf32>
    %7 = arith.mulf %4, %6 : vector<4x8x32xf32>
    %8 = arith.addf %3, %7 : vector<4x8x32xf32>
    %c0_11 = arith.constant 0 : index
    %c0_12 = arith.constant 0 : index
    %c0_13 = arith.constant 0 : index
    %9 = vector.load %arg3[%c0_11, %c0_12, %c0_13] : memref<4x8x32xf32, #tpu.memory_space<vmem>>, vector<4x8x32xf32>
    %c0_14 = arith.constant 0 : index
    %c0_15 = arith.constant 0 : index
    %c0_16 = arith.constant 0 : index
    %10 = vector.load %arg7[%c0_14, %c0_15, %c0_16] : memref<4x8x1xf32, #tpu.memory_space<vmem>>, vector<4x8x1xf32>
    %11 = vector.broadcast %10 : vector<4x8x1xf32> to vector<4x8x32xf32>
    %12 = arith.mulf %9, %11 : vector<4x8x32xf32>
    %c0_17 = arith.constant 0 : index
    %c0_18 = arith.constant 0 : index
    %c0_19 = arith.constant 0 : index
    %13 = vector.load %arg4[%c0_17, %c0_18, %c0_19] : memref<4x8x32xf32, #tpu.memory_space<vmem>>, vector<4x8x32xf32>
    %c0_20 = arith.constant 0 : index
    %c0_21 = arith.constant 0 : index
    %c0_22 = arith.constant 0 : index
    %14 = vector.load %arg8[%c0_20, %c0_21, %c0_22] : memref<4x8x1xf32, #tpu.memory_space<vmem>>, vector<4x8x1xf32>
    %15 = vector.broadcast %14 : vector<4x8x1xf32> to vector<4x8x32xf32>
    %16 = arith.mulf %13, %15 : vector<4x8x32xf32>
    %17 = arith.addf %12, %16 : vector<4x8x32xf32>
    %cst = arith.constant dense<0.000000e+00> : vector<4x32xf32>
    %18 = vector.multi_reduction <add>, %8, %cst [1] : vector<4x8x32xf32> to vector<4x32xf32>
    %cst_23 = arith.constant dense<0.000000e+00> : vector<4x32xf32>
    %19 = vector.multi_reduction <add>, %17, %cst_23 [1] : vector<4x8x32xf32> to vector<4x32xf32>
    %c0_24 = arith.constant 0 : index
    %c0_25 = arith.constant 0 : index
    %20 = vector.load %arg9[%c0_24, %c0_25] : memref<32x8xf32, #tpu.memory_space<vmem>>, vector<32x8xf32>
    %cst_26 = arith.constant dense<0.000000e+00> : vector<4x8xf32>
    %21 = tpu.matmul %18, %20, %cst_26 {dimension_numbers = #tpu.dot_dimension_numbers<[1], [0], [0], [1], [0, 0, 1, 1], [], []>} : vector<4x32xf32>, vector<32x8xf32>, vector<4x8xf32> -> vector<4x8xf32>
    %c0_27 = arith.constant 0 : index
    %c0_28 = arith.constant 0 : index
    %c0_29 = arith.constant 0 : index
    %22 = vector.load %arg10[%c0_27, %c0_28, %c0_29] : memref<2x4x8xf32, #tpu.memory_space<vmem>>, vector<1x4x8xf32>
    %23 = vector.shape_cast %22 : vector<1x4x8xf32> to vector<4x8xf32>
    %24 = vector.shape_cast %21 : vector<4x8xf32> to vector<1x4x8xf32>
    tpu.vector_store %arg10[%c0_27, %c0_28, %c0_29], %24 {strides = array<i32>} : memref<2x4x8xf32, #tpu.memory_space<vmem>>, vector<1x4x8xf32>,
    %cst_30 = arith.constant dense<0.000000e+00> : vector<4x8xf32>
    %25 = tpu.matmul %19, %20, %cst_30 {dimension_numbers = #tpu.dot_dimension_numbers<[1], [0], [0], [1], [0, 0, 1, 1], [], []>} : vector<4x32xf32>, vector<32x8xf32>, vector<4x8xf32> -> vector<4x8xf32>
    %c1 = arith.constant 1 : index
    %c0_31 = arith.constant 0 : index
    %c0_32 = arith.constant 0 : index
    %26 = vector.load %arg10[%c1, %c0_31, %c0_32] : memref<2x4x8xf32, #tpu.memory_space<vmem>>, vector<1x4x8xf32>
    %27 = vector.shape_cast %26 : vector<1x4x8xf32> to vector<4x8xf32>
    %28 = vector.shape_cast %25 : vector<4x8xf32> to vector<1x4x8xf32>
    tpu.vector_store %arg10[%c1, %c0_31, %c0_32], %28 {strides = array<i32>} : memref<2x4x8xf32, #tpu.memory_space<vmem>>, vector<1x4x8xf32>,
    return
  }
  func.func @transform_0(%arg0: i32) -> (i32, i32, i32) {
    %c0_i32 = arith.constant 0 : i32
    %c0_i32_0 = arith.constant 0 : i32
    %c0_i32_1 = arith.constant 0 : i32
    return %arg0, %c0_i32, %c0_i32_0 : i32, i32, i32
  }
  func.func @transform_1(%arg0: i32) -> (i32, i32, i32) {
    %c0_i32 = arith.constant 0 : i32
    %c0_i32_0 = arith.constant 0 : i32
    %c0_i32_1 = arith.constant 0 : i32
    return %arg0, %c0_i32, %c0_i32_0 : i32, i32, i32
  }
  func.func @transform_2(%arg0: i32) -> (i32, i32, i32) {
    %c0_i32 = arith.constant 0 : i32
    %c0_i32_0 = arith.constant 0 : i32
    %c0_i32_1 = arith.constant 0 : i32
    return %arg0, %c0_i32, %c0_i32_0 : i32, i32, i32
  }
  func.func @transform_3(%arg0: i32) -> (i32, i32, i32) {
    %c0_i32 = arith.constant 0 : i32
    %c0_i32_0 = arith.constant 0 : i32
    %c0_i32_1 = arith.constant 0 : i32
    return %arg0, %c0_i32, %c0_i32_0 : i32, i32, i32
  }
  func.func @transform_4(%arg0: i32) -> (i32, i32, i32) {
    %c0_i32 = arith.constant 0 : i32
    %c0_i32_0 = arith.constant 0 : i32
    %c0_i32_1 = arith.constant 0 : i32
    return %arg0, %c0_i32, %c0_i32_0 : i32, i32, i32
  }
  func.func @transform_5(%arg0: i32) -> (i32, i32, i32) {
    %c0_i32 = arith.constant 0 : i32
    %c0_i32_0 = arith.constant 0 : i32
    %c0_i32_1 = arith.constant 0 : i32
    return %arg0, %c0_i32, %c0_i32_0 : i32, i32, i32
  }
  func.func @transform_6(%arg0: i32) -> (i32, i32, i32) {
    %c0_i32 = arith.constant 0 : i32
    %c0_i32_0 = arith.constant 0 : i32
    %c0_i32_1 = arith.constant 0 : i32
    return %arg0, %c0_i32, %c0_i32_0 : i32, i32, i32
  }
  func.func @transform_7(%arg0: i32) -> (i32, i32, i32) {
    %c0_i32 = arith.constant 0 : i32
    %c0_i32_0 = arith.constant 0 : i32
    %c0_i32_1 = arith.constant 0 : i32
    return %arg0, %c0_i32, %c0_i32_0 : i32, i32, i32
  }
  func.func @transform_8(%arg0: i32) -> (i32, i32) {
    %c0_i32 = arith.constant 0 : i32
    %c0_i32_0 = arith.constant 0 : i32
    %c0_i32_1 = arith.constant 0 : i32
    return %c0_i32, %c0_i32_0 : i32, i32
  }
  func.func @transform_9(%arg0: i32) -> (i32, i32, i32) {
    %c0_i32 = arith.constant 0 : i32
    %c0_i32_0 = arith.constant 0 : i32
    %c0_i32_1 = arith.constant 0 : i32
    return %c0_i32, %arg0, %c0_i32_0 : i32, i32, i32
  }
}

</mosaic_0001>

<bundles_post_ra>
// kernel: tpu_custom_call.1
= control target key start
LH: loop header
LB: loop body
LE: loop exit
PB: predicated region body
PF: predicated region fallthrough
CT: control target
= control target key end

     0   :  { %v475_v2 = vmov 0   ;;  %s654_s0 = inlined_call_operand.vmem [shape: f32[4,8,32], index: 0, kind: input, shape index: {}]   ;;  %s655_s1 = inlined_call_operand.vmem [shape: f32[4,8,32], index: 1, kind: input, shape index: {}]   ;;  %s656_s2 = inlined_call_operand.vmem [shape: f32[4,8,32], index: 2, kind: input, shape index: {}]   ;;  %s657_s3 = inlined_call_operand.vmem [shape: f32[4,8,32], index: 3, kind: input, shape index: {}]   ;;  %s658_s4 = inlined_call_operand.vmem [shape: f32[4,8,1], index: 4, kind: input, shape index: {}]   ;;  %s659_s5 = inlined_call_operand.vmem [shape: f32[4,8,1], index: 5, kind: input, shape index: {}]   ;;  %s660_s6 = inlined_call_operand.vmem [shape: f32[4,8,1], index: 6, kind: input, shape index: {}]   ;;  %s661_s7 = inlined_call_operand.vmem [shape: f32[4,8,1], index: 7, kind: input, shape index: {}]   ;;  %s662_s8 = inlined_call_operand.vmem [shape: f32[32,8], index: 8, kind: input, shape index: {}]   ;;  %s663_s9 = inlined_call_operand.hbm [shape: f32[2,4,8], index: 9, kind: output, shape index: {}]  }
   0x1   :  { %v69_v0 = vld [vmem:[%s659_s5] sm:$0xff]  ;;  %452 = vset.pattern.permute.xlu1 %v475_v2  ;;  %451 = vset.pattern.permute.xlu0 %v475_v2  ;;  %v70_v3 = vld [vmem:[%s659_s5 + $0x8] sm:$0xff] }
   0x2   :  { %v37_v1 = vld [vmem:[%s658_s4] sm:$0xff]  ;;  %75 = vperm.xlu1 %452, %v69_v0   ;;  %v38_v4 = vld [vmem:[%s658_s4 + $0x8] sm:$0xff] }
   0x3   :  { %43 = vperm.xlu0 %451, %v37_v1   ;;  %v106_v5 = vld [vmem:[%s660_s6 + $0x8] sm:$0xff]  ;;  %v105_v6 = vld [vmem:[%s660_s6] sm:$0xff] }
   0x6   :  { %80 = vperm.xlu1 %452, %v70_v3  }
   0x7   :  { %48 = vperm.xlu0 %451, %v38_v4  }
   0x8   :  { %14 = vsyncpa [#allocation3], 0  ;;  %v138_v7 = vld [vmem:[%s661_s7 + $0x8] sm:$0xff]  ;;  %v137_v8 = vld [vmem:[%s661_s7] sm:$0xff]  ;;  %v476_v17 = vmov 0.0   ;;  %vm477_vm0 = vmmov 0  }
   0x9   :  { %v71_v9 = vld [vmem:[%s659_s5 + $0x10] sm:$0xff]  ;;  %v72_v13 = vld [vmem:[%s659_s5 + $0x18] sm:$0xff]  ;;  %423 = vmatprep.subr.mxu0 %v476_v17  ;;  %434 = vmatprep.subr.mxu1 %v476_v17  ;;  %v227_v20 = vld [vmem:[%s662_s8 + $0x8] sm:$0xff]  ;;  %vm169_vm1 = vcmask 261120   ;;  %vm234_vm2 = vcmask 1041409   ;;  %vm236_vm3 = vcmask 1042434  }
   0xa   :  { %116 = vperm.xlu1 %452, %v106_v5   ;;  %v39_v10 = vld [vmem:[%s658_s4 + $0x10] sm:$0xff]  ;;  %v40_v14 = vld [vmem:[%s658_s4 + $0x18] sm:$0xff]  ;;  %v226_v21 = vld [vmem:[%s662_s8] sm:$0xff]  ;;  %431 = vmatprep.mubr.msk.f32.mxu0 %vm477_vm0, %v476_v17  ;;  %vm238_vm4 = vcmask 1043459   ;;  %vm312_vm5 = vcmask 60416  }
   0xb   :  { %111 = vperm.xlu0 %451, %v105_v6   ;;  %v139_v11 = vld [vmem:[%s661_s7 + $0x10] sm:$0xff]  ;;  %v140_v15 = vld [vmem:[%s661_s7 + $0x18] sm:$0xff]  ;;  %442 = vmatprep.mubr.msk.f32.mxu1 %vm477_vm0, %v476_v17  ;;  %v65_v24 = vld [vmem:[%s655_s1] sm:$0xff] }
   0xc   :  { %v107_v12 = vld [vmem:[%s660_s6 + $0x10] sm:$0xff]  ;;  %v108_v16 = vld [vmem:[%s660_s6 + $0x18] sm:$0xff]  ;;  %v33_v25 = vld [vmem:[%s654_s0] sm:$0xff] }
   0xd   :  { %v229_v18 = vld [vmem:[%s662_s8 + $0x18] sm:$0xff]  ;;  %v228_v19 = vld [vmem:[%s662_s8 + $0x10] sm:$0xff]  ;;  %v66_v26 = vld [vmem:[%s655_s1 + $0x8] sm:$0xff] }
   0xe   :  { %148 = vperm.xlu1 %452, %v138_v7   ;;  %424 = vmatpush3.msra.mxu0 %v229_v18  ;;  %v34_v27 = vld [vmem:[%s654_s0 + $0x8] sm:$0xff]  ;;  %v101_v39 = vld [vmem:[%s656_s2] sm:$0xff]  ;;  %v67_v50 = vld [vmem:[%s655_s1 + $0x10] sm:$0xff] }
   0xf   :  { %143 = vperm.xlu0 %451, %v137_v8   ;;  %435 = vmatpush3.msra.mxu1 %v229_v18  ;;  %v102_v38 = vld [vmem:[%s656_s2 + $0x8] sm:$0xff]  ;;  %v133_v41 = vld [vmem:[%s657_s3] sm:$0xff]  ;;  %v35_v51 = vld [vmem:[%s654_s0 + $0x10] sm:$0xff] }
  0x10   :  { %425 = vmatprep.subr.mxu0 %v476_v17  ;;  %436 = vmatprep.subr.mxu1 %v476_v17  ;;  %v134_v40 = vld [vmem:[%s657_s3 + $0x8] sm:$0xff]  ;;  %v135_v62 = vld [vmem:[%s657_s3 + $0x10] sm:$0xff] }
  0x11   :  { %426 = vmatpush3.msra.mxu0 %v228_v19  ;;  %437 = vmatpush3.msra.mxu1 %v228_v19  ;;  %v103_v63 = vld [vmem:[%s656_s2 + $0x10] sm:$0xff] }
  0x12   :  { %85 = vperm.xlu1 %452, %v71_v9   ;;  %427 = vmatprep.subr.mxu0 %v476_v17 }
  0x13   :  { %53 = vperm.xlu0 %451, %v39_v10   ;;  %438 = vmatprep.subr.mxu1 %v476_v17 }
  0x14   :  { %428 = vmatpush3.msra.mxu0 %v227_v20  ;;  %439 = vmatpush3.msra.mxu1 %v227_v20 }
  0x15   :  { %429 = vmatprep.subr.mxu0 %v476_v17  ;;  %440 = vmatprep.subr.mxu1 %v476_v17 }
  0x16   :  { %153 = vperm.xlu1 %452, %v139_v11   ;;  %430 = vmatpush3.msra.mxu0 %v226_v21  ;;  %v68_v11 = vld [vmem:[%s655_s1 + $0x18] sm:$0xff] }
  0x17   :  { %121 = vperm.xlu0 %451, %v107_v12   ;;  %441 = vmatpush3.msra.mxu1 %v226_v21  ;;  %v36_v12 = vld [vmem:[%s654_s0 + $0x18] sm:$0xff] }
  0x1a   :  { %90 = vperm.xlu1 %452, %v72_v13  }
  0x1b   :  { %58 = vperm.xlu0 %451, %v40_v14  }
  0x1e   :  { %158 = vperm.xlu1 %452, %v140_v15  }
  0x1f   :  { %126 = vperm.xlu0 %451, %v108_v16  }
  0x7d   :  { %v76_v22 = vpop.permute.xlu1 %75 }
  0x7e   :  { %v44_v23 = vpop.permute.xlu0 %43  ;;  %v93_v28 = vmul.f32 %v76_v22, %v65_v24 }
  0x7f   :  { %v61_v29 = vmul.f32 %v44_v23, %v33_v25 }
  0x81   :  { %v81_v30 = vpop.permute.xlu1 %80  ;;  %v97_v34 = vadd.f32 %v93_v28, %v61_v29 }
  0x82   :  { %v49_v31 = vpop.permute.xlu0 %48  ;;  %v94_v32 = vmul.f32 %v81_v30, %v66_v26  ;;  %v136_v26 = vld [vmem:[%s657_s3 + $0x18] sm:$0xff] }
  0x83   :  { %v62_v33 = vmul.f32 %v49_v31, %v34_v27  ;;  %v170_v42 = vsel %vm169_vm1, %v97_v34, 0.0  ;;  %v104_v27 = vld [vmem:[%s656_s2 + $0x18] sm:$0xff]  ;;  %s478_s2 = smov [#allocation2]  }
  0x84   :  { %v171_v55 = vrot.slane %v170_v42, 4  ;;  %s400_s3 = sshll.u32 %s478_s2, 4  ;;  %s401_s3 = int_to_ptr.vmem [resolvable:$true] %s400_s3 }
  0x85   :  { %v98_v35 = vadd.f32 %v94_v32, %v62_v33  ;;  %v117_v36 = vpop.permute.xlu1 %116  ;;  %s453_s28 = scalar_lea.vmem %s401_s3, 128  ;;  %p458_p1 = scmp.lt.s32.totalorder %s401_s3, %s401_s3 }
  0x86   :  { %v112_v37 = vpop.permute.xlu0 %111  ;;  %v130_v46 = vmul.f32 %v117_v36, %v102_v38  ;;  %v172_v2 = vadd.f32 %v171_v55, %v170_v42  ;;  %p454_p0 = scmp.ne.s32.totalorder %s401_s3, %s453_s28  ;;  %p459_p2 = scmp.lt.s32.totalorder %s453_s28, %s453_s28 }
  0x87   :  { %v177_v43 = vsel %vm169_vm1, %v98_v35, 0.0  ;;  %v129_v47 = vmul.f32 %v112_v37, %v101_v39 }
  0x88   :  { %v178_v52 = vrot.slane %v177_v43, 4  ;;  %v173_v15 = vrot.slane %v172_v2, 2  ;;  %p460_p3 = por %p459_p2, %p458_p1 }
  0x89   :  { %v149_v44 = vpop.permute.xlu1 %148 }
  0x8a   :  { %v144_v45 = vpop.permute.xlu0 %143  ;;  %v162_v48 = vmul.f32 %v149_v44, %v134_v40  ;;  %v179_v0 = vadd.f32 %v178_v52, %v177_v43  ;;  %v174_v30 = vadd.f32 %v173_v15, %v172_v2  ;;  %p461_p4 = pnand %p460_p3, %p454_p0 }
  0x8b   :  { %v161_v49 = vmul.f32 %v144_v45, %v133_v41 }
  0x8c   :  { %v166_v53 = vadd.f32 %v162_v48, %v130_v46  ;;  %v180_v13 = vrot.slane %v179_v0, 2 }
  0x8d   :  { %v165_v54 = vadd.f32 %v161_v49, %v129_v47  ;;  %v86_v56 = vpop.permute.xlu1 %85  ;;  %v175_v47 = vrot.slane %v174_v30, 1 }
  0x8e   :  { %v54_v57 = vpop.permute.xlu0 %53  ;;  %v205_v58 = vsel %vm169_vm1, %v166_v53, 0.0  ;;  %v95_v60 = vmul.f32 %v86_v56, %v67_v50  ;;  %v181_v28 = vadd.f32 %v180_v13, %v179_v0 }
  0x8f   :  { %v198_v59 = vsel %vm169_vm1, %v165_v54, 0.0  ;;  %v63_v61 = vmul.f32 %v54_v57, %v35_v51  ;;  %v206_v3 = vrot.slane %v205_v58, 4 }
  0x90   :  { %v199_v4 = vrot.slane %v198_v59, 4  ;;  %v182_v42 = vrot.slane %v181_v28, 1 }
  0x91   :  { %v99_v1 = vadd.f32 %v95_v60, %v63_v61  ;;  %v154_v5 = vpop.permute.xlu1 %153  ;;  %v207_v16 = vadd.f32 %v206_v3, %v205_v58  ;;  %v176_v58 = vadd.f32 %v175_v47, %v174_v30 }
  0x92   :  { %v122_v6 = vpop.permute.xlu0 %121  ;;  %v163_v8 = vmul.f32 %v154_v5, %v135_v62  ;;  %v200_v17 = vadd.f32 %v199_v4, %v198_v59  ;;  %v183_v53 = vadd.f32 %v182_v42, %v181_v28 }
  0x93   :  { %v184_v7 = vsel %vm169_vm1, %v99_v1, 0.0  ;;  %v131_v9 = vmul.f32 %v122_v6, %v103_v63  ;;  %v208_v31 = vrot.slane %v207_v16, 2 }
  0x94   :  { %v185_v10 = vrot.slane %v184_v7, 4  ;;  %v201_v32 = vrot.slane %v200_v17, 2  ;;  %v235_v63 = vsel %vm234_vm2, %v183_v53, %v176_v58 }
  0x95   :  { %v167_v14 = vadd.f32 %v163_v8, %v131_v9  ;;  %v91_v19 = vpop.permute.xlu1 %90  ;;  %v209_v44 = vadd.f32 %v208_v31, %v207_v16 }
  0x96   :  { %v186_v18 = vadd.f32 %v185_v10, %v184_v7  ;;  %v59_v20 = vpop.permute.xlu0 %58  ;;  %v96_v22 = vmul.f32 %v91_v19, %v68_v11  ;;  %v202_v45 = vadd.f32 %v201_v32, %v200_v17 }
  0x97   :  { %v212_v21 = vsel %vm169_vm1, %v167_v14, 0.0  ;;  %v64_v23 = vmul.f32 %v59_v20, %v36_v12  ;;  %v210_v54 = vrot.slane %v209_v44, 1 }
  0x98   :  { %v187_v24 = vrot.slane %v186_v18, 2  ;;  %v213_v25 = vrot.slane %v212_v21, 4  ;;  %v203_v55 = vrot.slane %v202_v45, 1 }
  0x99   :  { %v100_v29 = vadd.f32 %v96_v22, %v64_v23  ;;  %v159_v34 = vpop.permute.xlu1 %158  ;;  %v211_v0 = vadd.f32 %v210_v54, %v209_v44 }
  0x9a   :  { %v214_v33 = vadd.f32 %v213_v25, %v212_v21  ;;  %v127_v35 = vpop.permute.xlu0 %126  ;;  %v188_v36 = vadd.f32 %v187_v24, %v186_v18  ;;  %v164_v38 = vmul.f32 %v159_v34, %v136_v26  ;;  %v204_v1 = vadd.f32 %v203_v55, %v202_v45 }
  0x9b   :  { %v191_v37 = vsel %vm169_vm1, %v100_v29, 0.0  ;;  %v132_v39 = vmul.f32 %v127_v35, %v104_v27 }
  0x9c   :  { %v215_v40 = vrot.slane %v214_v33, 2  ;;  %v192_v41 = vrot.slane %v191_v37, 4  ;;  %v189_v48 = vrot.slane %v188_v36, 1  ;;  %v318_v9 = vsel %vm234_vm2, %v211_v0, %v204_v1 }
  0x9d   :  { %v168_v43 = vadd.f32 %v164_v38, %v132_v39 }
  0x9e   :  { %v193_v46 = vadd.f32 %v192_v41, %v191_v37  ;;  %v216_v49 = vadd.f32 %v215_v40, %v214_v33  ;;  %v190_v59 = vadd.f32 %v189_v48, %v188_v36 }
  0x9f   :  { %v219_v50 = vsel %vm169_vm1, %v168_v43, 0.0 }
  0xa0   :  { %v194_v51 = vrot.slane %v193_v46, 2  ;;  %v220_v52 = vrot.slane %v219_v50, 4  ;;  %v217_v60 = vrot.slane %v216_v49, 1  ;;  %v237_v5 = vsel %vm236_vm3, %v190_v59, %v235_v63 }
  0xa2   :  { %v195_v56 = vadd.f32 %v194_v51, %v193_v46  ;;  %v221_v57 = vadd.f32 %v220_v52, %v219_v50  ;;  %v218_v4 = vadd.f32 %v217_v60, %v216_v49 }
  0xa4   :  { %v196_v61 = vrot.slane %v195_v56, 1  ;;  %v222_v62 = vrot.slane %v221_v57, 2  ;;  %v319_v10 = vsel %vm236_vm3, %v218_v4, %v318_v9 }
  0xa6   :  { %v223_v2 = vadd.f32 %v222_v62, %v221_v57  ;;  %v197_v3 = vadd.f32 %v196_v61, %v195_v56 }
  0xa8   :  { %v224_v6 = vrot.slane %v223_v2, 1  ;;  %v239_v7 = vsel %vm238_vm4, %v197_v3, %v237_v5 }
  0xa9   :  { %432 = vmatmul.mubr.msk.f32.vlgmr.msra.gmra.mxu0 %vm169_vm1, %v239_v7 }
  0xaa   :  { %v225_v8 = vadd.f32 %v224_v6, %v223_v2 }
  0xac   :  { %v320_v11 = vsel %vm238_vm4, %v225_v8, %v319_v10 }
  0xad   :  { %443 = vmatmul.mubr.msk.f32.vlgmr.msra.gmra.mxu1 %vm169_vm1, %v320_v11 }
 0x169   :  { %v308_v12 = vpop.f32.mrf.mxu0 }
 0x16a   :  { %313 = vst.msk [vmem:[#allocation2] sm:$0xf] %vm312_vm5, %v308_v12 }
 0x16b   :  { %v433_v13 = vpop.f32.mrf.mxu0 }
 0x16d   :  { %v389_v14 = vpop.f32.mrf.mxu1 }
 0x16e   :  { %394 = vst.msk [vmem:[#allocation2 + $0x4] sm:$0xf] %vm312_vm5, %v389_v14 }
 0x16f   :  { %v444_v15 = vpop.f32.mrf.mxu1 }
 0x170   :  { %464 = shalt.err (!%p461_p4)
}
 0x171   :  { %s479_s29 = smov 64   ;;  %s480_s8 = smov 4  }
 0x172   :  { %406 = dma.vmem_to_hbm [thread:$0]  %s401_s3, 128, %s663_s9, [#allocation3], %s479_s29, %s479_s29, %s480_s8  }
 0x173   :  { %473 = dma.done.wait [#allocation3], 128  }
 0x174   :  { %474 = vsyncadd [#allocation3], 4294967168 }
 0x175   :  { %410 = vsyncpa [#allocation3], 1 }

</bundles_post_ra>
